<compile_context>
chip_gen: v6e
topology: v6e:2x2x1
jax: 0.10.0
libtpu: 0.0.40
codegen_flags: <defaults>
</compile_context>

<pallas_src>
import numpy as np
import jax
import jax.numpy as jnp
from jax.experimental import pallas as pl
from jax.experimental.pallas import tpu as pltpu


# ----------------------------- Pallas kernel ---------------------------------
def _patchmap_kernel(x_ref, w_ref, b_ref, o_ref):
    # x: [TM, K] (native dtype), w: [K, N] bf16, b: [1, N] f32, o: [TM, N] f32
    x = x_ref[...].astype(jnp.bfloat16)                       # cast in-kernel (no HBM copy)
    y = jnp.dot(x, w_ref[...], preferred_element_type=jnp.float32)  # single-pass bf16 MXU
    o_ref[...] = (y + b_ref[...]).astype(o_ref.dtype)         # f32 epilogue + lane-dense store


# ----------------------------- weight prep (hoisted, once) --------------------
def prepare_patch_map_params(w1, b1, w2, b2):
    """Precompute the Kronecker-collapsed weight (bf16) and fused bias (f32).

    w1 : [p1, pred] (= torch Linear(p1, pred).weight.T),  b1 : [pred]
    w2 : [p2, I]    (= torch Linear(p2, I).weight.T),     b2 : [I]
    """
    pred = w1.shape[1]
    I = w2.shape[1]
    k_w = jnp.kron(w1.astype(jnp.float32), w2.astype(jnp.float32))        # [p1*p2, pred*I] f32
    k_w = k_w.astype(jnp.bfloat16)                                        # MXU operand dtype
    k_b = (b1.astype(jnp.float32)[:, None] * jnp.sum(w2.astype(jnp.float32), axis=0)[None, :]
           + b2.astype(jnp.float32)[None, :])                             # [pred, I]
    k_b = k_b.reshape(1, pred * I)                                        # f32 fused bias
    return k_w, k_b


# ----------------------------- forward wrapper --------------------------------
def mlp_patch_map(x, k_w, k_b, *, prediction_length, input_size):
    """MLPPatchMap forward using precomputed (k_w, k_b).

    x : [B, C, p1, p2]  ->  returns [B, C, prediction_length, input_size] (float32)
    """
    Bb, C, p1, p2 = x.shape
    M = Bb * C
    K = p1 * p2
    N = prediction_length * input_size
    assert k_w.shape == (K, N) and k_b.shape == (1, N)

    # Free, contiguous reshape; keep native dtype (cast happens inside the kernel).
    x_flat = x.reshape(M, K)

    # Single grid step at small shapes; row-tile only when B*C is large.
    if M <= 512:
        tm = M
    else:
        tm = 512                       # >=512-row blocks reach ~85% of HBM roofline
    row_steps = pl.cdiv(M, tm)

    compiler_params = None
    if row_steps > 1 and tm >= 256:
        # Only shard across TensorCores when each core gets substantial per-step work.
        compiler_params = pltpu.CompilerParams(dimension_semantics=("parallel",))

    out = pl.pallas_call(
        _patchmap_kernel,
        out_shape=jax.ShapeDtypeStruct((M, N), jnp.float32),
        grid=(row_steps,),
        in_specs=[
            pl.BlockSpec((tm, K), lambda i: (i, 0)),   # row slab of flattened patches
            pl.BlockSpec((K, N), lambda i: (0, 0)),    # Kron weight, resident across steps
            pl.BlockSpec((1, N), lambda i: (0, 0)),    # fused bias, resident
        ],
        out_specs=pl.BlockSpec((tm, N), lambda i: (i, 0)),   # N = 128 -> unmasked vst
        compiler_params=compiler_params,
    )(x_flat, k_w, k_b)

    return out.reshape(Bb, C, prediction_length, input_size)


# ----------------------------- pure-JAX reference -----------------------------
def mlp_patch_map_reference(x, w1, b1, w2, b2):
    """Literal PyTorch sequence: rearrange, Linear(p1,pred), rearrange, Linear(p2,I)."""
    y = jnp.swapaxes(x, -1, -2)          # 'b c w h -> b c h w'  : [B, C, p2, p1]
    y = y @ w1 + b1                      # Linear(p1 -> pred)     : [B, C, p2, pred]
    y = jnp.swapaxes(y, -1, -2)          # 'b c h w -> b c w h'  : [B, C, pred, p2]
    y = y @ w2 + b2                      # Linear(p2 -> I)        : [B, C, pred, I]
    return y


# ----------------------------- main -------------------------------------------
if __name__ == "__main__":
    # Shapes implied by the TsT model: channels = embedding dim, spatial dims = patch grid.
    B, C = 2, 32                      # batch, encoder embedding channels
    PATCH = (4, 4)
    CONTEXT, PRED, INPUT = 16, 8, 16  # pred * input = 128 -> lane-dense output
    p1, p2 = CONTEXT // PATCH[0], INPUT // PATCH[1]   # 4, 4

    key = jax.random.PRNGKey(0)
    kx, k1, k2, k3, k4 = jax.random.split(key, 5)
    x = jax.random.normal(kx, (B, C, p1, p2), jnp.float32)
    w1 = jax.random.normal(k1, (p1, PRED), jnp.float32) * 0.1
    b1 = jax.random.normal(k2, (PRED,), jnp.float32) * 0.1
    w2 = jax.random.normal(k3, (p2, INPUT), jnp.float32) * 0.1
    b2 = jax.random.normal(k4, (INPUT,), jnp.float32) * 0.1

    # Hoisted once per weight set (not per forward call).
    k_w, k_b = prepare_patch_map_params(w1, b1, w2, b2)
    jax.block_until_ready((k_w, k_b))

    out = mlp_patch_map(x, k_w, k_b, prediction_length=PRED, input_size=INPUT)
    jax.block_until_ready(out)

    ref = mlp_patch_map_reference(x, w1, b1, w2, b2)
    assert out.shape == (B, C, PRED, INPUT)
    # bf16 MXU operands with K=16 accumulation in f32 -> loosened tolerance.
    np.testing.assert_allclose(np.asarray(out), np.asarray(ref), rtol=3e-2, atol=3e-2)

    print("KERNEL_OK")
</pallas_src>

<mosaic_0001>
module attributes {stable_mosaic.version = 11 : i64} {
  func.func @_patchmap_kernel(%arg0: i32, %arg1: memref<64x16xf32, #tpu.memory_space<vmem>>, %arg2: memref<16x128xbf16, #tpu.memory_space<vmem>>, %arg3: memref<1x128xf32, #tpu.memory_space<vmem>>, %arg4: memref<64x128xf32, #tpu.memory_space<vmem>>) attributes {dimension_semantics = [#tpu.dimension_semantics<arbitrary>], iteration_bounds = array<i64: 1>, scalar_prefetch = 0 : i64, scratch_operands = 0 : i64, tpu.core_type = #tpu.core_type<tc>, window_params = [{transform_indices = @transform_0, window_bounds = array<i64: 64, 16>}, {pipeline_mode = #tpu.pipeline_mode<synchronous>, transform_indices = @transform_1, window_bounds = array<i64: 16, 128>}, {pipeline_mode = #tpu.pipeline_mode<synchronous>, transform_indices = @transform_2, window_bounds = array<i64: 1, 128>}, {transform_indices = @transform_3, window_bounds = array<i64: 64, 128>}]} {
    %c0 = arith.constant 0 : index
    %c0_0 = arith.constant 0 : index
    %0 = vector.load %arg1[%c0, %c0_0] : memref<64x16xf32, #tpu.memory_space<vmem>>, vector<64x16xf32>
    %1 = arith.truncf %0 : vector<64x16xf32> to vector<64x16xbf16>
    %c0_1 = arith.constant 0 : index
    %c0_2 = arith.constant 0 : index
    %2 = vector.load %arg2[%c0_1, %c0_2] : memref<16x128xbf16, #tpu.memory_space<vmem>>, vector<16x128xbf16>
    %cst = arith.constant dense<0.000000e+00> : vector<64x128xf32>
    %3 = tpu.matmul %1, %2, %cst {dimension_numbers = #tpu.dot_dimension_numbers<[1], [0], [0], [1], [0, 0, 1, 1], [], []>} : vector<64x16xbf16>, vector<16x128xbf16>, vector<64x128xf32> -> vector<64x128xf32>
    %c0_3 = arith.constant 0 : index
    %c0_4 = arith.constant 0 : index
    %4 = vector.load %arg3[%c0_3, %c0_4] : memref<1x128xf32, #tpu.memory_space<vmem>>, vector<1x128xf32>
    %5 = vector.broadcast %4 : vector<1x128xf32> to vector<64x128xf32>
    %6 = arith.addf %3, %5 : vector<64x128xf32>
    %c0_5 = arith.constant 0 : index
    %c0_6 = arith.constant 0 : index
    %7 = vector.load %arg4[%c0_5, %c0_6] : memref<64x128xf32, #tpu.memory_space<vmem>>, vector<64x128xf32>
    tpu.vector_store %arg4[%c0_5, %c0_6], %6 {strides = array<i32>} : memref<64x128xf32, #tpu.memory_space<vmem>>, vector<64x128xf32>,
    return
  }
  func.func @transform_0(%arg0: i32) -> (i32, i32) {
    %c0_i32 = arith.constant 0 : i32
    %c0_i32_0 = arith.constant 0 : i32
    return %arg0, %c0_i32 : i32, i32
  }
  func.func @transform_1(%arg0: i32) -> (i32, i32) {
    %c0_i32 = arith.constant 0 : i32
    %c0_i32_0 = arith.constant 0 : i32
    %c0_i32_1 = arith.constant 0 : i32
    return %c0_i32, %c0_i32_0 : i32, i32
  }
  func.func @transform_2(%arg0: i32) -> (i32, i32) {
    %c0_i32 = arith.constant 0 : i32
    %c0_i32_0 = arith.constant 0 : i32
    %c0_i32_1 = arith.constant 0 : i32
    return %c0_i32, %c0_i32_0 : i32, i32
  }
  func.func @transform_3(%arg0: i32) -> (i32, i32) {
    %c0_i32 = arith.constant 0 : i32
    %c0_i32_0 = arith.constant 0 : i32
    return %arg0, %c0_i32 : i32, i32
  }
}

</mosaic_0001>

<bundles_post_ra>
// kernel: tpu_custom_call.1
= control target key start
LH: loop header
LB: loop body
LE: loop exit
PB: predicated region body
PF: predicated region fallthrough
CT: control target
= control target key end

     0   :  { %vm43_vm0 = vcmask 130048   ;;  %s254_s0 = inlined_call_operand.vmem [shape: f32[64,16], index: 0, kind: input, shape index: {}]   ;;  %s255_s1 = inlined_call_operand.vmem [shape: bf16[16,128], index: 1, kind: input, shape index: {}]   ;;  %s256_s2 = inlined_call_operand.vmem [shape: f32[1,128], index: 2, kind: input, shape index: {}]   ;;  %s257_s3 = inlined_call_operand.hbm [shape: f32[64,128], index: 3, kind: output, shape index: {}]  }
   0x1   :  { %v171_v0 = vld [vmem:[%s255_s1] sm:$0xff]   ;;  %v17_v2 = vld [vmem:[%s254_s0 + $0x8] sm:$0xff]  ;;  %v18_v6 = vld [vmem:[%s254_s0 + $0x10] sm:$0xff] }
   0x2   :  { %v16_v1 = vld [vmem:[%s254_s0] sm:$0xff]  ;;  %156 = vmatprep.subr.bf16.mxu0 %v171_v0  ;;  %166 = vmatprep.subr.bf16.mxu1 %v171_v0  ;;  %v21_v5 = vld [vmem:[%s254_s0 + $0x28] sm:$0xff]  ;;  %v19_v7 = vld [vmem:[%s254_s0 + $0x18] sm:$0xff] }
   0x3   :  { %v20_v3 = vld [vmem:[%s254_s0 + $0x20] sm:$0xff]  ;;  %v24_v4 = vpack.c.bf16 %v17_v2, %v16_v1  ;;  %157 = vmatpush3.bf16.msra.mxu0 %v171_v0  ;;  %167 = vmatpush3.bf16.msra.mxu1 %v171_v0  ;;  %v25_v9 = vpack.c.bf16 %v19_v7, %v18_v6  ;;  %v22_v10 = vld [vmem:[%s254_s0 + $0x30] sm:$0xff]  ;;  %v23_v11 = vld [vmem:[%s254_s0 + $0x38] sm:$0xff] }
   0x4   :  { %v26_v8 = vpack.c.bf16 %v21_v5, %v20_v3 }
   0x5   :  { %8 = vsyncpa [#allocation3], 0  ;;  %158 = vmatprep.mubr.msk.bf16.mxu0 %vm43_vm0, %v24_v4  ;;  %v27_v12 = vpack.c.bf16 %v23_v11, %v22_v10  ;;  %v145_v13 = vld [vmem:[%s256_s2] ss:$0 sm:$0xff]  ;;  %s194_s0 = smov [#allocation2]  }
   0x6   :  { %162 = vmatprep.mubr.msk.bf16.mxu1 %vm43_vm0, %v26_v8  ;;  %159 = vmatmul.mubr.msk.bf16.vlgmr.msra.gmra.mxu0 %vm43_vm0, %v25_v9  ;;  %s134_s4 = sshll.u32 %s194_s0, 4  ;;  %s135_s4 = int_to_ptr.vmem [resolvable:$true] %s134_s4 }
   0x7   :  { %163 = vmatmul.mubr.msk.bf16.vlgmr.msra.gmra.mxu1 %vm43_vm0, %v27_v12  ;;  %s172_s2 = scalar_lea.vmem %s135_s4, 1024  ;;  %p177_p1 = scmp.lt.s32.totalorder %s135_s4, %s135_s4 }
   0x8   :  { %p173_p0 = scmp.ne.s32.totalorder %s135_s4, %s172_s2  ;;  %p178_p2 = scmp.lt.s32.totalorder %s172_s2, %s172_s2 }
   0xa   :  { %p179_p3 = por %p178_p2, %p177_p1 }
   0xc   :  { %p180_p4 = pnand %p179_p3, %p173_p0 }
  0xc6   :  { %v160_v14 = vpop.f32.mrf.mxu0 }
  0xc7   :  { %v164_v15 = vpop.f32.mrf.mxu1  ;;  %v99_v16 = vadd.f32 %v160_v14, %v145_v13 }
  0xc8   :  { %v115_v17 = vadd.f32 %v164_v15, %v145_v13  ;;  %v90_v18 = vpop.f32.mrf.mxu0 }
  0xc9   :  { %v106_v19 = vpop.f32.mrf.mxu1  ;;  %123 = vst [vmem:[#allocation2 + $0x10] sm:$0xff] %v99_v16  ;;  %v91_v20 = vadd.f32 %v145_v13, %v90_v18 }
  0xca   :  { %127 = vst [vmem:[#allocation2 + $0x30] sm:$0xff] %v115_v17  ;;  %v107_v21 = vadd.f32 %v145_v13, %v106_v19  ;;  %v161_v22 = vpop.f32.mrf.mxu0 }
  0xcb   :  { %v165_v23 = vpop.f32.mrf.mxu1  ;;  %121 = vst [vmem:[#allocation2] sm:$0xff] %v91_v20  ;;  %v102_v24 = vadd.f32 %v161_v22, %v145_v13 }
  0xcc   :  { %125 = vst [vmem:[#allocation2 + $0x20] sm:$0xff] %v107_v21  ;;  %v118_v25 = vadd.f32 %v165_v23, %v145_v13  ;;  %v93_v26 = vpop.f32.mrf.mxu0 }
  0xcd   :  { %v109_v27 = vpop.f32.mrf.mxu1  ;;  %124 = vst [vmem:[#allocation2 + $0x18] sm:$0xff] %v102_v24  ;;  %v94_v28 = vadd.f32 %v145_v13, %v93_v26 }
  0xce   :  { %128 = vst [vmem:[#allocation2 + $0x38] sm:$0xff] %v118_v25  ;;  %v110_v29 = vadd.f32 %v145_v13, %v109_v27 }
  0xcf   :  { %122 = vst [vmem:[#allocation2 + $0x8] sm:$0xff] %v94_v28 }
  0xd0   :  { %126 = vst [vmem:[#allocation2 + $0x28] sm:$0xff] %v110_v29 }
  0xd1   :  { %183 = shalt.err (!%p180_p4)
}
  0xd2   :  { %s195_s5 = smov 128   ;;  %s196_s6 = smov 8  }
  0xd3   :  { %140 = dma.vmem_to_hbm [thread:$0]  %s135_s4, 1024, %s257_s3, [#allocation3], %s195_s5, %s195_s5, %s196_s6  }
  0xd4   :  { %192 = dma.done.wait [#allocation3], 1024  }
  0xd5   :  { %193 = vsyncadd [#allocation3], 4294966272 }
  0xd6   :  { %144 = vsyncpa [#allocation3], 1 }

</bundles_post_ra>
